<compile_context>
chip_gen: v6e
topology: v6e:2x2x1
jax: 0.10.0
libtpu: 0.0.40
codegen_flags: <defaults>
</compile_context>

<pallas_src>
import math

import jax
import jax.numpy as jnp
from jax.experimental import pallas as pl
from jax.experimental.pallas import tpu as pltpu


_LOG2_E = 1.4426950408889634  # log2(e)
_N_TERMS = 10                 # ln(2)^10/10! ~ 7e-9  << f32 eps -> converged
_POLY_COEFFS = tuple(math.log(2.0) ** i / math.factorial(i) for i in range(_N_TERMS))


def _as19_softmax_kernel(x_ref, o_ref):
    x = x_ref[...].astype(jnp.float32)

    # row-wise mean subtraction (XLU cross-lane reduce)
    x = x - jnp.mean(x, axis=1, keepdims=True)

    # exp(x) = 2^floor(a) * exp(ln2 * frac),  a = x*log2(e),  frac in [0, 1)
    a = x * _LOG2_E
    flo = jnp.floor(a)
    frac = a - flo
    flo = jnp.clip(flo, -126.0, 125.0)  # keep the exponent field in range

    # exact 2^floor via exponent-field construction (stays on the VPU)
    two_pow = pltpu.bitcast((flo.astype(jnp.int32) + 127) << 23, jnp.float32)

    # Horner evaluation of the truncated AS19 exp(ln2 * frac) series (10 terms)
    poly = _POLY_COEFFS[-1] * frac + _POLY_COEFFS[-2]
    for c in _POLY_COEFFS[-3::-1]:
        poly = poly * frac + c

    e = two_pow * poly

    s = jnp.sum(e, axis=1, keepdims=True)
    inv = pl.reciprocal(s, approx=True)   # EUP slot (otherwise idle)
    inv = inv * (2.0 - s * inv)           # one Newton step -> full f32 accuracy
    o_ref[...] = (e * inv).astype(o_ref.dtype)


def _round_up(v, m):
    return ((v + m - 1) // m) * m


def _vmem_budget_bytes():
    cap = None
    try:
        cap = getattr(pltpu.get_tpu_info(), "vmem_capacity_bytes", None)
    except Exception:
        cap = None
    if not cap:
        cap = 64 * 1024 * 1024  # conservative: v7x has 64 MiB per TensorCore
    # use at most half the physical capacity, never above 64 MiB scoped
    return int(min(cap // 2, 64 * 1024 * 1024))


def as19_softmax(x):
    """AS19 approximate softmax along axis=1 of a 2-D (batch, features) array."""
    assert x.ndim == 2, "expected (data_len, feature_len)"
    B, F = x.shape
    assert B >= 1 and F >= 1
    orig_dtype = x.dtype

    f_lanes = _round_up(F, 128)                        # physical lane footprint
    itemsize = x.dtype.itemsize
    sub = {4: 8, 2: 16, 1: 32}.get(itemsize, 8)        # sublane packing granule

    vmem_budget = _vmem_budget_bytes()
    # per-row VMEM: double-buffered in+out blocks (input dtype) + ~3 f32 intermediates
    per_row_bytes = f_lanes * (4 * itemsize + 3 * 4)
    tb_cap = max(sub, ((vmem_budget * 3 // 4) // per_row_bytes) // sub * sub)
    # target ~4 MiB (f32-equivalent) blocks to amortize per-grid-step overhead
    tb_target = max(sub, ((4 << 20) // (f_lanes * 4)) // sub * sub)

    if B <= sub:
        tb = B  # block dim equal to full array dim is always legal
    else:
        tb = min(tb_cap, tb_target, _round_up(B, sub))
        # keep at least 2 grid steps so ("parallel",) can use both v7x TensorCores
        half = max(sub, _round_up(pl.cdiv(B, 2), sub))
        tb = max(sub, min(tb, half))

    grid = (pl.cdiv(B, tb),)

    out = pl.pallas_call(
        _as19_softmax_kernel,
        out_shape=jax.ShapeDtypeStruct((B, F), orig_dtype),
        grid_spec=pltpu.PrefetchScalarGridSpec(
            num_scalar_prefetch=0,
            grid=grid,
            in_specs=[pl.BlockSpec((tb, F), lambda i: (i, 0))],
            out_specs=pl.BlockSpec((tb, F), lambda i: (i, 0)),
        ),
        compiler_params=pltpu.CompilerParams(
            dimension_semantics=("parallel",),
            vmem_limit_bytes=vmem_budget,
        ),
    )(x)
    return out


def as19_softmax_ref(x):
    """Pure-JAX literal transcription of the PyTorch forward (float32)."""
    x = x.astype(jnp.float32)
    p = jnp.asarray(
        [math.log(2.0) ** i / math.factorial(i) for i in range(100)],
        dtype=jnp.float32,
    )
    x = x - jnp.mean(x, axis=1, keepdims=True)
    a = jnp.abs(x) * jnp.float32(math.log(math.e, 2))
    dec = a - jnp.trunc(a)
    integer = jnp.clip(a - dec, -150.0, 125.0)
    e = jnp.zeros_like(dec)
    for i in range(100):
        e = e + p[i] * dec ** i
    e = jnp.power(2.0, integer) * e
    e = jnp.where(x < 0, 1.0 / e, e)
    s = jnp.sum(e, axis=1, keepdims=True)
    return e / s


if __name__ == "__main__":
    key = jax.random.PRNGKey(0)
    # small 2-D (data_len, feature_len) input, consistent with the module
    B, F = 8, 32
    x = jax.random.normal(key, (B, F), dtype=jnp.float32) * 3.0

    out = jax.block_until_ready(as19_softmax(x))
    ref = as19_softmax_ref(x)

    assert out.shape == (B, F)
    err = float(jnp.max(jnp.abs(out - ref)))
    assert jnp.allclose(out, ref, atol=1e-5, rtol=1e-5), f"max abs err = {err}"
    assert jnp.allclose(jnp.sum(out, axis=1), 1.0, atol=1e-5)

    # also exercise the non-aligned path (partial trailing batch block, ragged F)
    x2 = jax.random.normal(jax.random.PRNGKey(1), (10, 40), dtype=jnp.float32)
    out2 = jax.block_until_ready(as19_softmax(x2))
    ref2 = as19_softmax_ref(x2)
    err2 = float(jnp.max(jnp.abs(out2 - ref2)))
    assert jnp.allclose(out2, ref2, atol=1e-5, rtol=1e-5), f"max abs err = {err2}"

    print("KERNEL_OK")
</pallas_src>

<mosaic_0001>
module attributes {stable_mosaic.version = 11 : i64} {
  func.func @_as19_softmax_kernel(%arg0: i32, %arg1: memref<8x32xf32, #tpu.memory_space<vmem>>, %arg2: memref<8x32xf32, #tpu.memory_space<vmem>>) attributes {dimension_semantics = [#tpu.dimension_semantics<parallel>], iteration_bounds = array<i64: 1>, scalar_prefetch = 0 : i64, scratch_operands = 0 : i64, tpu.core_type = #tpu.core_type<tc>, window_params = [{transform_indices = @transform_0, window_bounds = array<i64: 8, 32>}, {transform_indices = @transform_1, window_bounds = array<i64: 8, 32>}]} {
    %c0 = arith.constant 0 : index
    %c0_0 = arith.constant 0 : index
    %0 = vector.load %arg1[%c0, %c0_0] : memref<8x32xf32, #tpu.memory_space<vmem>>, vector<8x32xf32>
    %cst = arith.constant dense<0.000000e+00> : vector<8xf32>
    %1 = vector.multi_reduction <add>, %0, %cst [1] : vector<8x32xf32> to vector<8xf32>
    %2 = vector.shape_cast %1 : vector<8xf32> to vector<8x1xf32>
    %cst_1 = arith.constant 3.200000e+01 : f32
    %3 = vector.broadcast %cst_1 : f32 to vector<8x1xf32>
    %4 = arith.divf %2, %3 : vector<8x1xf32>
    %5 = vector.broadcast %4 : vector<8x1xf32> to vector<8x32xf32>
    %6 = arith.subf %0, %5 : vector<8x32xf32>
    %cst_2 = arith.constant 1.44269502 : f32
    %7 = vector.broadcast %cst_2 : f32 to vector<8x32xf32>
    %8 = arith.mulf %6, %7 : vector<8x32xf32>
    %9 = math.floor %8 : vector<8x32xf32>
    %10 = arith.subf %8, %9 : vector<8x32xf32>
    %cst_3 = arith.constant -1.260000e+02 : f32
    %cst_4 = arith.constant 1.250000e+02 : f32
    %11 = vector.broadcast %cst_3 : f32 to vector<8x32xf32>
    %12 = arith.maximumf %11, %9 : vector<8x32xf32>
    %13 = vector.broadcast %cst_4 : f32 to vector<8x32xf32>
    %14 = arith.minimumf %13, %12 : vector<8x32xf32>
    %15 = arith.fptosi %14 : vector<8x32xf32> to vector<8x32xi32>
    %c127_i32 = arith.constant 127 : i32
    %16 = vector.broadcast %c127_i32 : i32 to vector<8x32xi32>
    %17 = arith.addi %15, %16 : vector<8x32xi32>
    %c23_i32 = arith.constant 23 : i32
    %18 = vector.broadcast %c23_i32 : i32 to vector<8x32xi32>
    %19 = arith.shli %17, %18 : vector<8x32xi32>
    %20 = tpu.bitcast %19 : vector<8x32xi32> -> vector<8x32xf32>
    %cst_5 = arith.constant 1.01780863E-7 : f32
    %21 = vector.broadcast %cst_5 : f32 to vector<8x32xf32>
    %22 = arith.mulf %21, %10 : vector<8x32xf32>
    %cst_6 = arith.constant 1.32154867E-6 : f32
    %23 = vector.broadcast %cst_6 : f32 to vector<8x32xf32>
    %24 = arith.addf %22, %23 : vector<8x32xf32>
    %25 = arith.mulf %24, %10 : vector<8x32xf32>
    %cst_7 = arith.constant 1.52527336E-5 : f32
    %26 = vector.broadcast %cst_7 : f32 to vector<8x32xf32>
    %27 = arith.addf %25, %26 : vector<8x32xf32>
    %28 = arith.mulf %27, %10 : vector<8x32xf32>
    %cst_8 = arith.constant 1.54035297E-4 : f32
    %29 = vector.broadcast %cst_8 : f32 to vector<8x32xf32>
    %30 = arith.addf %28, %29 : vector<8x32xf32>
    %31 = arith.mulf %30, %10 : vector<8x32xf32>
    %cst_9 = arith.constant 0.00133335579 : f32
    %32 = vector.broadcast %cst_9 : f32 to vector<8x32xf32>
    %33 = arith.addf %31, %32 : vector<8x32xf32>
    %34 = arith.mulf %33, %10 : vector<8x32xf32>
    %cst_10 = arith.constant 0.00961812865 : f32
    %35 = vector.broadcast %cst_10 : f32 to vector<8x32xf32>
    %36 = arith.addf %34, %35 : vector<8x32xf32>
    %37 = arith.mulf %36, %10 : vector<8x32xf32>
    %cst_11 = arith.constant 0.0555041097 : f32
    %38 = vector.broadcast %cst_11 : f32 to vector<8x32xf32>
    %39 = arith.addf %37, %38 : vector<8x32xf32>
    %40 = arith.mulf %39, %10 : vector<8x32xf32>
    %cst_12 = arith.constant 0.240226507 : f32
    %41 = vector.broadcast %cst_12 : f32 to vector<8x32xf32>
    %42 = arith.addf %40, %41 : vector<8x32xf32>
    %43 = arith.mulf %42, %10 : vector<8x32xf32>
    %cst_13 = arith.constant 0.693147182 : f32
    %44 = vector.broadcast %cst_13 : f32 to vector<8x32xf32>
    %45 = arith.addf %43, %44 : vector<8x32xf32>
    %46 = arith.mulf %45, %10 : vector<8x32xf32>
    %cst_14 = arith.constant 1.000000e+00 : f32
    %47 = vector.broadcast %cst_14 : f32 to vector<8x32xf32>
    %48 = arith.addf %46, %47 : vector<8x32xf32>
    %49 = arith.mulf %20, %48 : vector<8x32xf32>
    %cst_15 = arith.constant dense<0.000000e+00> : vector<8xf32>
    %50 = vector.multi_reduction <add>, %49, %cst_15 [1] : vector<8x32xf32> to vector<8xf32>
    %51 = vector.shape_cast %50 : vector<8xf32> to vector<8x1xf32>
    %52 = tpu.reciprocal %51 {approx = true} : vector<8x1xf32> -> vector<8x1xf32>
    %53 = arith.mulf %51, %52 : vector<8x1xf32>
    %cst_16 = arith.constant 2.000000e+00 : f32
    %54 = vector.broadcast %cst_16 : f32 to vector<8x1xf32>
    %55 = arith.subf %54, %53 : vector<8x1xf32>
    %56 = arith.mulf %52, %55 : vector<8x1xf32>
    %57 = vector.broadcast %56 : vector<8x1xf32> to vector<8x32xf32>
    %58 = arith.mulf %49, %57 : vector<8x32xf32>
    %c0_17 = arith.constant 0 : index
    %c0_18 = arith.constant 0 : index
    %59 = vector.load %arg2[%c0_17, %c0_18] : memref<8x32xf32, #tpu.memory_space<vmem>>, vector<8x32xf32>
    tpu.vector_store %arg2[%c0_17, %c0_18], %58 {strides = array<i32>} : memref<8x32xf32, #tpu.memory_space<vmem>>, vector<8x32xf32>,
    return
  }
  func.func @transform_0(%arg0: i32) -> (i32, i32) {
    %c0_i32 = arith.constant 0 : i32
    %c0_i32_0 = arith.constant 0 : i32
    return %arg0, %c0_i32 : i32, i32
  }
  func.func @transform_1(%arg0: i32) -> (i32, i32) {
    %c0_i32 = arith.constant 0 : i32
    %c0_i32_0 = arith.constant 0 : i32
    return %arg0, %c0_i32 : i32, i32
  }
}

</mosaic_0001>

<bundles_post_ra>
// kernel: tpu_custom_call.1
= control target key start
LH: loop header
LB: loop body
LE: loop exit
PB: predicated region body
PF: predicated region fallthrough
CT: control target
= control target key end

     0   :  { %6 = vsyncpa [#allocation3], 0  ;;  %s152_s0 = inlined_call_operand.hbm [shape: f32[8,32], index: 0, kind: input, shape index: {}]   ;;  %s153_s1 = inlined_call_operand.hbm [shape: f32[8,32], index: 1, kind: output, shape index: {}]  }
   0x1   :  { %7 = vsyncpa [#allocation4], 0  ;;  %s131_s6 = smov [#allocation2]  }
   0x2   :  { %s14_s7 = sshll.u32 %s131_s6, 4  ;;  %s15_s7 = int_to_ptr.vmem [resolvable:$true] %s14_s7 }
   0x3   :  { %s95_s8 = scalar_lea.vmem %s15_s7, 128  ;;  %p100_p1 = scmp.lt.s32.totalorder %s15_s7, %s15_s7 }
   0x4   :  { %p96_p0 = scmp.ne.s32.totalorder %s15_s7, %s95_s8  ;;  %p101_p2 = scmp.lt.s32.totalorder %s95_s8, %s95_s8 }
   0x6   :  { %p102_p3 = por %p101_p2, %p100_p1 }
   0x8   :  { %p103_p4 = pnand %p102_p3, %p96_p0 }
   0xa   :  { %106 = shalt.err (!%p103_p4)
}
   0xb   :  { %17 = dma.hbm_to_vmem [thread:$0]  %s152_s0, 128, %s15_s7, [#allocation3]  }
   0xc   :  { %127 = dma.done.wait [#allocation3], 128  }
   0xd   :  { %128 = vsyncadd [#allocation3], 4294967168  ;;  %vm22_vm0 = vcmask 261120   ;;  %v21_v0 = vld [vmem:[#allocation2] sm:$0xff]  ;;  %s132_s0 = smov [#allocation5]  }
   0xe   :  { %v23_v1 = vsel %vm22_vm0, %v21_v0, 0.0  ;;  %s72_s11 = sshll.u32 %s132_s0, 4  ;;  %s73_s11 = int_to_ptr.vmem [resolvable:$true] %s72_s11 }
   0xf   :  { %24 = vadd.xlane.f32.xlu0 %v23_v1  ;;  %s107_s12 = scalar_lea.vmem %s73_s11, 128  ;;  %p112_p6 = scmp.lt.s32.totalorder %s73_s11, %s73_s11 }
  0x10   :  { %p108_p5 = scmp.ne.s32.totalorder %s73_s11, %s107_s12  ;;  %p113_p7 = scmp.lt.s32.totalorder %s107_s12, %s107_s12 }
  0x12   :  { %p114_p8 = por %p113_p7, %p112_p6 }
  0x14   :  { %p115_p9 = pnand %p114_p8, %p108_p5 }
  0x98   :  { %v25_v2 = vpop.xlane.xlu0 %24 }
  0x99   :  { %v27_v3 = vmul.f32 0.03125, %v25_v2 }
  0x9b   :  { %v28_v4 = vsub.f32 %v21_v0, %v27_v3 }
  0x9d   :  { %v29_v5 = vmul.f32 1.442695, %v28_v4 }
  0x9f   :  { %v30_v6 = vfloor.f32 %v29_v5 }
  0xa1   :  { %v31_v7 = vsub.f32 %v29_v5, %v30_v6  ;;  %v32_v15 = vmax.f32 %v30_v6, -126.0 }
  0xa3   :  { %v38_v8 = vmul.f32 1.0178086e-07, %v31_v7  ;;  %v33_v18 = vmin.f32 %v32_v15, 125.0 }
  0xa5   :  { %v39_v9 = vadd.f32 1.3215487e-06, %v38_v8  ;;  %v81_v21 = vtrunc.f32 %v33_v18 }
  0xa7   :  { %v40_v10 = vmul.f32 %v39_v9, %v31_v7  ;;  %v82_v24 = vcvt.f32.s32 %v81_v21 }
  0xa9   :  { %v41_v11 = vadd.f32 1.5252734e-05, %v40_v10  ;;  %v35_v27 = vadd.s32 127, %v82_v24 }
  0xab   :  { %v42_v12 = vmul.f32 %v41_v11, %v31_v7  ;;  %v36_v30 = vshll.u32 %v35_v27, 23 }
  0xad   :  { %v43_v13 = vadd.f32 0.0001540353, %v42_v12 }
  0xaf   :  { %v44_v14 = vmul.f32 %v43_v13, %v31_v7 }
  0xb1   :  { %v45_v16 = vadd.f32 0.0013333558, %v44_v14 }
  0xb3   :  { %v46_v17 = vmul.f32 %v45_v16, %v31_v7 }
  0xb5   :  { %v47_v19 = vadd.f32 0.009618129, %v46_v17 }
  0xb7   :  { %v48_v20 = vmul.f32 %v47_v19, %v31_v7 }
  0xb9   :  { %v49_v22 = vadd.f32 0.05550411, %v48_v20 }
  0xbb   :  { %v50_v23 = vmul.f32 %v49_v22, %v31_v7 }
  0xbd   :  { %v51_v25 = vadd.f32 0.2402265, %v50_v23 }
  0xbf   :  { %v52_v26 = vmul.f32 %v51_v25, %v31_v7 }
  0xc1   :  { %v53_v28 = vadd.f32 0.6931472, %v52_v26 }
  0xc3   :  { %v54_v29 = vmul.f32 %v53_v28, %v31_v7 }
  0xc5   :  { %v55_v31 = vadd.f32 1.0, %v54_v29 }
  0xc7   :  { %v56_v32 = vmul.f32 %v55_v31, %v36_v30 }
  0xc9   :  { %v57_v33 = vsel %vm22_vm0, %v56_v32, 0.0 }
  0xca   :  { %58 = vadd.xlane.f32.xlu0 %v57_v33 }
 0x153   :  { %v59_v34 = vpop.xlane.xlu0 %58 }
 0x154   :  { %85 = vrcp.f32 %v59_v34 }
 0x161   :  { %v86_v35 = vpop.eup %85 }
 0x162   :  { %v61_v36 = vmul.f32 %v86_v35, %v59_v34 }
 0x164   :  { %v62_v37 = vsub.f32 2.0, %v61_v36 }
 0x166   :  { %v63_v38 = vmul.f32 %v86_v35, %v62_v37 }
 0x168   :  { %v64_v39 = vmul.f32 %v63_v38, %v56_v32 }
 0x16a   :  { %65 = vst.msk [vmem:[#allocation5] sm:$0xff] %vm22_vm0, %v64_v39 }
 0x16b   :  { %118 = shalt.err (!%p115_p9)
}
 0x16c   :  { %75 = dma.vmem_to_hbm [thread:$0]  %s73_s11, 128, %s153_s1, [#allocation4]  }
 0x16d   :  { %129 = dma.done.wait [#allocation4], 128  }
 0x16e   :  { %130 = vsyncadd [#allocation4], 4294967168 }
 0x16f   :  { %79 = vsyncpa [#allocation3], 1 }
 0x170   :  { %80 = vsyncpa [#allocation4], 1 }

</bundles_post_ra>
